<compile_context>
chip_gen: v6e
topology: v6e:2x2x1
jax: 0.10.0
libtpu: 0.0.40
codegen_flags: <defaults>
</compile_context>

<pallas_src>
import jax
import jax.numpy as jnp
import numpy as np
from jax.experimental import pallas as pl
from jax.experimental.pallas import tpu as pltpu

_LANE = 128
# Per-block byte budget: with double buffering of input + output (4 live
# tiles) this is ~8 MiB of VMEM, comfortably inside every generation's
# scoped-VMEM default, while big enough to sit near the HBM roofline.
_TARGET_BLOCK_BYTES = 2 * 1024 * 1024


def _identity_kernel(x_ref, o_ref):
    # Pure identity: full-tile VMEM copy (output aliases the input at HBM level).
    o_ref[...] = x_ref[...]


def _sublane_multiple(dtype) -> int:
    # Sub-32-bit dtypes pack along sublanes; keep row tiles a multiple of the
    # packing factor (8 for 32-bit, 16 for bf16/f16, 32 for int8/fp8).
    itemsize = jnp.dtype(dtype).itemsize
    return 8 * max(1, 4 // max(1, itemsize))


def _choose_lane_width(n: int) -> int:
    # Widest lane-dense width (multiple of 128) that exactly divides the flat size.
    for lanes in (8192, 4096, 2048, 1024, 512, 256, 128):
        if n % lanes == 0:
            return lanes
    return 0  # no exact factorization; caller pads.


def input_identity(x: jnp.ndarray) -> jnp.ndarray:
    """Identity op (y = x) implemented as a Pallas TPU kernel."""
    orig_shape = x.shape
    orig_dtype = x.dtype
    n = int(x.size)

    if n == 0:
        # Nothing to copy; the identity of an empty array is itself.
        return x

    flat = x.reshape(-1)

    # Lane-dense 2D view: (rows, lanes) with lanes a wide multiple of 128.
    lanes = _choose_lane_width(n)
    pad = 0
    if lanes == 0:
        lanes = _LANE if n < 1024 else 1024
        padded_n = pl.cdiv(n, lanes) * lanes
        pad = padded_n - n
        flat = jnp.pad(flat, (0, pad))

    rows = flat.size // lanes
    x2 = flat.reshape(rows, lanes)

    # Tile rows by a byte budget, rounded to the sublane packing multiple.
    itemsize = jnp.dtype(orig_dtype).itemsize
    sub = _sublane_multiple(orig_dtype)
    tile_rows = max(1, _TARGET_BLOCK_BYTES // (lanes * itemsize))
    tile_rows = max(sub, (tile_rows // sub) * sub)
    tile_rows = min(tile_rows, rows)  # == rows (full dim) for small inputs

    grid = (pl.cdiv(rows, tile_rows),)  # ragged last block handled by Pallas

    out = pl.pallas_call(
        _identity_kernel,
        out_shape=jax.ShapeDtypeStruct((rows, lanes), orig_dtype),
        grid_spec=pltpu.PrefetchScalarGridSpec(
            num_scalar_prefetch=0,
            grid=grid,
            in_specs=[pl.BlockSpec((tile_rows, lanes), lambda i: (i, 0))],
            out_specs=pl.BlockSpec((tile_rows, lanes), lambda i: (i, 0)),
        ),
        compiler_params=pltpu.CompilerParams(
            dimension_semantics=("parallel",),
        ),
        # Identity: the output may reuse the input's HBM buffer. Under a jit
        # that donates x this removes the HBM round-trip entirely; otherwise
        # XLA inserts at most one copy.
        input_output_aliases={0: 0},
    )(x2)

    if pad:
        out = out.reshape(-1)[:n]
    return out.reshape(orig_shape)


if __name__ == "__main__":
    # InputIdentity has no parameters (input_name is debug-only metadata).
    key = jax.random.PRNGKey(0)
    x = jax.random.normal(key, (2, 4, 16, 16), dtype=jnp.float32)  # NCHW

    # Snapshot to host before the call: the kernel output may alias x's buffer.
    x_host = np.asarray(x)

    y = input_identity(x)
    y = jax.block_until_ready(y)

    assert y.shape == x_host.shape, (y.shape, x_host.shape)
    assert str(y.dtype) == str(x_host.dtype), (y.dtype, x_host.dtype)
    np.testing.assert_array_equal(np.asarray(y), x_host)

    print("KERNEL_OK")
</pallas_src>

<mosaic_0001>
module attributes {stable_mosaic.version = 11 : i64} {
  func.func @_identity_kernel(%arg0: i32, %arg1: memref<1x2048xf32, #tpu.memory_space<vmem>>, %arg2: memref<1x2048xf32, #tpu.memory_space<vmem>>) attributes {dimension_semantics = [#tpu.dimension_semantics<parallel>], iteration_bounds = array<i64: 1>, scalar_prefetch = 0 : i64, scratch_operands = 0 : i64, tpu.core_type = #tpu.core_type<tc>, window_params = [{transform_indices = @transform_0, window_bounds = array<i64: 1, 2048>}, {transform_indices = @transform_1, window_bounds = array<i64: 1, 2048>}]} {
    %c0 = arith.constant 0 : index
    %c0_0 = arith.constant 0 : index
    %0 = vector.load %arg1[%c0, %c0_0] : memref<1x2048xf32, #tpu.memory_space<vmem>>, vector<1x2048xf32>
    %c0_1 = arith.constant 0 : index
    %c0_2 = arith.constant 0 : index
    %1 = vector.load %arg2[%c0_1, %c0_2] : memref<1x2048xf32, #tpu.memory_space<vmem>>, vector<1x2048xf32>
    tpu.vector_store %arg2[%c0_1, %c0_2], %0 {strides = array<i32>} : memref<1x2048xf32, #tpu.memory_space<vmem>>, vector<1x2048xf32>,
    return
  }
  func.func @transform_0(%arg0: i32) -> (i32, i32) {
    %c0_i32 = arith.constant 0 : i32
    %c0_i32_0 = arith.constant 0 : i32
    return %arg0, %c0_i32 : i32, i32
  }
  func.func @transform_1(%arg0: i32) -> (i32, i32) {
    %c0_i32 = arith.constant 0 : i32
    %c0_i32_0 = arith.constant 0 : i32
    return %arg0, %c0_i32 : i32, i32
  }
}

</mosaic_0001>

<bundles_post_ra>
// kernel: tpu_custom_call.1
= control target key start
LH: loop header
LB: loop body
LE: loop exit
PB: predicated region body
PF: predicated region fallthrough
CT: control target
= control target key end

     0   :  { %6 = vsyncpa [#allocation3], 0  ;;  %s104_s0 = inlined_call_operand.hbm [shape: f32[1,2048], index: 0, kind: input, shape index: {}, may-alias: {0,1}]   ;;  %s105_s1 = inlined_call_operand.hbm [shape: f32[1,2048], index: 1, kind: output, shape index: {}, may-alias: {0,1}]  }
   0x1   :  { %7 = vsyncpa [#allocation4], 0  ;;  %s86_s6 = smov [#allocation2]  }
   0x2   :  { %s14_s7 = sshll.u32 %s86_s6, 4  ;;  %s15_s7 = int_to_ptr.vmem [resolvable:$true] %s14_s7 }
   0x3   :  { %s50_s8 = scalar_lea.vmem %s15_s7, 256  ;;  %p55_p1 = scmp.lt.s32.totalorder %s15_s7, %s15_s7 }
   0x4   :  { %p51_p0 = scmp.ne.s32.totalorder %s15_s7, %s50_s8  ;;  %p56_p2 = scmp.lt.s32.totalorder %s50_s8, %s50_s8 }
   0x6   :  { %p57_p3 = por %p56_p2, %p55_p1 }
   0x8   :  { %p58_p4 = pnand %p57_p3, %p51_p0 }
   0xa   :  { %61 = shalt.err (!%p58_p4)
}
   0xb   :  { %17 = dma.hbm_to_vmem [thread:$0]  %s104_s0, 256, %s15_s7, [#allocation3]  }
   0xc   :  { %82 = dma.done.wait [#allocation3], 256  }
   0xd   :  { %83 = vsyncadd [#allocation3], 4294967040  ;;  %s87_s11 = smov [#allocation5]   ;;  %v21_v0 = vld [vmem:[#allocation2] sm:$0xff]  ;;  %v22_v1 = vld [vmem:[#allocation2 + $0x8] sm:$0xff] }
   0xe   :  { %s31_s12 = sshll.u32 %s87_s11, 4  ;;  %23 = vst [vmem:[#allocation5] sm:$0xff] %v21_v0  ;;  %24 = vst [vmem:[#allocation5 + $0x8] sm:$0xff] %v22_v1  ;;  %s32_s12 = int_to_ptr.vmem [resolvable:$true] %s31_s12 }
   0xf   :  { %s62_s13 = scalar_lea.vmem %s32_s12, 256  ;;  %p67_p6 = scmp.lt.s32.totalorder %s32_s12, %s32_s12 }
  0x10   :  { %p63_p5 = scmp.ne.s32.totalorder %s32_s12, %s62_s13  ;;  %p68_p7 = scmp.lt.s32.totalorder %s62_s13, %s62_s13 }
  0x12   :  { %p69_p8 = por %p68_p7, %p67_p6 }
  0x14   :  { %p70_p9 = pnand %p69_p8, %p63_p5 }
  0x16   :  { %73 = shalt.err (!%p70_p9)
}
  0x17   :  { %34 = dma.vmem_to_hbm [thread:$0]  %s32_s12, 256, %s105_s1, [#allocation4]  }
  0x18   :  { %84 = dma.done.wait [#allocation4], 256  }
  0x19   :  { %85 = vsyncadd [#allocation4], 4294967040 }
  0x1a   :  { %38 = vsyncpa [#allocation3], 1 }
  0x1b   :  { %39 = vsyncpa [#allocation4], 1 }

</bundles_post_ra>
